<compile_context>
chip_gen: v7x
topology: tpu7x:2x2x1
jax: 0.10.0
libtpu: 0.0.40
codegen_flags: <defaults>
</compile_context>

<pallas_src>
import functools

import jax
import jax.numpy as jnp
from jax.experimental import pallas as pl
from jax.experimental.pallas import tpu as pltpu


def _lse_kernel(x_ref, w_ref, o_ref, acc_ref, *, mxu_dtype):
    # Grid = (M//tm, N//tn, K//tk); K (last axis) is the reduction axis.
    @pl.when(pl.program_id(2) == 0)
    def _():
        acc_ref[...] = jnp.zeros_like(acc_ref)

    # Fused exp on the weight tile (tn, tk). exp is computed in f32 for accuracy.
    w_exp = jnp.exp(w_ref[...].astype(jnp.float32))
    x_tile = x_ref[...]
    if mxu_dtype is not None:
        # Optional reduced-precision MXU operands (e.g. bf16 on v6e/v7x).
        w_exp = w_exp.astype(mxu_dtype)
        x_tile = x_tile.astype(mxu_dtype)

    # x_tile (tm, tk) contracted with w_exp (tn, tk) along K -> (tm, tn).
    # The transpose is folded into the MXU operand feed (no XLU .T).
    acc_ref[...] += jax.lax.dot_general(
        x_tile,
        w_exp,
        dimension_numbers=(((1,), (1,)), ((), ())),
        preferred_element_type=jnp.float32,
    )

    @pl.when(pl.program_id(2) == pl.num_programs(2) - 1)
    def _():
        o_ref[...] = acc_ref[...].astype(o_ref.dtype)


def _round_up(a, b):
    return ((a + b - 1) // b) * b


def _pick_tiles(M, N, K):
    # Amortize the fused exp over the whole batch: tm = full (rounded) M, capped.
    tm = min(_round_up(M, 8), 256)
    tn = min(_round_up(N, 128), 256)
    tk = min(_round_up(K, 128), 512)
    # Keep >= 2 parallel grid iterations when shapes allow (v7x has 2 TCs).
    if _round_up(M, tm) // tm == 1 and _round_up(N, tn) // tn == 1 and N > 128:
        tn = 128
    return tm, tn, tk


def library_size_estimator(x, log_weights, *, tm=None, tn=None, tk=None,
                           mxu_dtype=None):
    """Computes x @ exp(log_weights).T with a tiled Pallas TPU kernel.

    x:            (M, K)  (batch, in_features)
    log_weights:  (N, K)  (out_features, in_features)
    returns:      (M, N)  float32
    """
    x = jnp.asarray(x, jnp.float32)
    log_weights = jnp.asarray(log_weights, jnp.float32)
    M, K = x.shape
    N, Kw = log_weights.shape
    assert K == Kw, "in_features mismatch"

    atm, atn, atk = _pick_tiles(M, N, K)
    tm = atm if tm is None else tm
    tn = atn if tn is None else tn
    tk = atk if tk is None else tk

    Mp, Np, Kp = _round_up(M, tm), _round_up(N, tn), _round_up(K, tk)
    # Zero-pad: padded x columns are zero, so padded weight entries (exp(0)=1)
    # contribute nothing to the reduction; padded output rows/cols are sliced off.
    xp = x if (Mp == M and Kp == K) else jnp.pad(x, ((0, Mp - M), (0, Kp - K)))
    wp = (log_weights if (Np == N and Kp == K)
          else jnp.pad(log_weights, ((0, Np - N), (0, Kp - K))))

    grid = (Mp // tm, Np // tn, Kp // tk)
    kernel = functools.partial(_lse_kernel, mxu_dtype=mxu_dtype)

    out = pl.pallas_call(
        kernel,
        out_shape=jax.ShapeDtypeStruct((Mp, Np), jnp.float32),
        grid_spec=pltpu.PrefetchScalarGridSpec(
            num_scalar_prefetch=0,
            grid=grid,
            in_specs=[
                pl.BlockSpec((tm, tk), lambda i, j, k: (i, k)),   # x tile
                pl.BlockSpec((tn, tk), lambda i, j, k: (j, k)),   # log_weights tile
            ],
            out_specs=pl.BlockSpec((tm, tn), lambda i, j, k: (i, j)),
            scratch_shapes=[pltpu.VMEM((tm, tn), jnp.float32)],
        ),
        compiler_params=pltpu.CompilerParams(
            dimension_semantics=("parallel", "parallel", "arbitrary"),
        ),
    )(xp, wp)

    if Mp != M or Np != N:
        out = out[:M, :N]
    return out


if __name__ == "__main__":
    key = jax.random.PRNGKey(0)
    k1, k2, k3 = jax.random.split(key, 3)

    # Case 1: mirrors the module after _reset_parameters() (zero log-weights),
    # with deliberately non-tile-aligned feature sizes (exercises padding).
    batch, in_features, out_features = 8, 96, 80
    x1 = jax.random.normal(k1, (batch, in_features), dtype=jnp.float32)
    log_w1 = jnp.zeros((out_features, in_features), dtype=jnp.float32)
    out1 = jax.block_until_ready(library_size_estimator(x1, log_w1))
    ref1 = x1 @ jnp.exp(log_w1).T
    assert out1.shape == (batch, out_features)
    assert jnp.allclose(out1, ref1, atol=2e-3, rtol=2e-3)

    # Case 2: nonzero log-weights, larger ragged shapes (padding on M/N/K).
    batch, in_features, out_features = 16, 300, 200
    x2 = jax.random.normal(k2, (batch, in_features), dtype=jnp.float32)
    log_w2 = 0.1 * jax.random.normal(k3, (out_features, in_features),
                                     dtype=jnp.float32)
    out2 = jax.block_until_ready(library_size_estimator(x2, log_w2))
    ref2 = x2 @ jnp.exp(log_w2).T
    assert out2.shape == (batch, out_features)
    assert jnp.allclose(out2, ref2, atol=2e-3, rtol=2e-3)

    print("KERNEL_OK")
</pallas_src>

<mosaic_0001>
module attributes {stable_mosaic.version = 11 : i64} {
  func.func @_lse_kernel(%arg0: i32, %arg1: i32, %arg2: i32, %arg3: memref<8x128xf32, #tpu.memory_space<vmem>>, %arg4: memref<128x128xf32, #tpu.memory_space<vmem>>, %arg5: memref<8x128xf32, #tpu.memory_space<vmem>>, %arg6: memref<8x128xf32, #tpu.memory_space<vmem>>) attributes {dimension_semantics = [#tpu.dimension_semantics<parallel>, #tpu.dimension_semantics<parallel>, #tpu.dimension_semantics<arbitrary>], iteration_bounds = array<i64: 1, 1, 1>, scalar_prefetch = 0 : i64, scratch_operands = 1 : i64, tpu.core_type = #tpu.core_type<tc>, window_params = [{transform_indices = @transform_0, window_bounds = array<i64: 8, 128>}, {transform_indices = @transform_1, window_bounds = array<i64: 128, 128>}, {transform_indices = @transform_2, window_bounds = array<i64: 8, 128>}]} {
    %c0_i32 = arith.constant 0 : i32
    %0 = arith.cmpi eq, %arg2, %c0_i32 : i32
    %1 = arith.extui %0 : i1 to i32
    %c0_i32_0 = arith.constant 0 : i32
    %2 = arith.cmpi ne, %1, %c0_i32_0 : i32
    scf.if %2 {
      %cst_10 = arith.constant 0.000000e+00 : f32
      %13 = vector.broadcast %cst_10 : f32 to vector<8x128xf32>
      %c0_11 = arith.constant 0 : index
      %c0_12 = arith.constant 0 : index
      %14 = vector.load %arg6[%c0_11, %c0_12] : memref<8x128xf32, #tpu.memory_space<vmem>>, vector<8x128xf32>
      tpu.vector_store %arg6[%c0_11, %c0_12], %13 {strides = array<i32>} : memref<8x128xf32, #tpu.memory_space<vmem>>, vector<8x128xf32>,
    } else {
    }
    %c0 = arith.constant 0 : index
    %c0_1 = arith.constant 0 : index
    %3 = vector.load %arg4[%c0, %c0_1] : memref<128x128xf32, #tpu.memory_space<vmem>>, vector<128x128xf32>
    %4 = math.exp %3 : vector<128x128xf32>
    %c0_2 = arith.constant 0 : index
    %c0_3 = arith.constant 0 : index
    %5 = vector.load %arg3[%c0_2, %c0_3] : memref<8x128xf32, #tpu.memory_space<vmem>>, vector<8x128xf32>
    %c0_4 = arith.constant 0 : index
    %c0_5 = arith.constant 0 : index
    %6 = vector.load %arg6[%c0_4, %c0_5] : memref<8x128xf32, #tpu.memory_space<vmem>>, vector<8x128xf32>
    %cst = arith.constant dense<0.000000e+00> : vector<8x128xf32>
    %7 = tpu.matmul %5, %4, %cst {dimension_numbers = #tpu.dot_dimension_numbers<[1], [1], [0], [0], [0, 0, 1, 0], [], []>} : vector<8x128xf32>, vector<128x128xf32>, vector<8x128xf32> -> vector<8x128xf32>
    %8 = arith.addf %6, %7 : vector<8x128xf32>
    %c0_6 = arith.constant 0 : index
    %c0_7 = arith.constant 0 : index
    %9 = vector.load %arg6[%c0_6, %c0_7] : memref<8x128xf32, #tpu.memory_space<vmem>>, vector<8x128xf32>
    tpu.vector_store %arg6[%c0_6, %c0_7], %8 {strides = array<i32>} : memref<8x128xf32, #tpu.memory_space<vmem>>, vector<8x128xf32>,
    %c0_i32_8 = arith.constant 0 : i32
    %10 = arith.cmpi eq, %arg2, %c0_i32_8 : i32
    %11 = arith.extui %10 : i1 to i32
    %c0_i32_9 = arith.constant 0 : i32
    %12 = arith.cmpi ne, %11, %c0_i32_9 : i32
    scf.if %12 {
      %c0_10 = arith.constant 0 : index
      %c0_11 = arith.constant 0 : index
      %13 = vector.load %arg6[%c0_10, %c0_11] : memref<8x128xf32, #tpu.memory_space<vmem>>, vector<8x128xf32>
      %c0_12 = arith.constant 0 : index
      %c0_13 = arith.constant 0 : index
      %14 = vector.load %arg5[%c0_12, %c0_13] : memref<8x128xf32, #tpu.memory_space<vmem>>, vector<8x128xf32>
      tpu.vector_store %arg5[%c0_12, %c0_13], %13 {strides = array<i32>} : memref<8x128xf32, #tpu.memory_space<vmem>>, vector<8x128xf32>,
    } else {
    }
    return
  }
  func.func @transform_0(%arg0: i32, %arg1: i32, %arg2: i32) -> (i32, i32) {
    %c0_i32 = arith.constant 0 : i32
    return %arg0, %arg2 : i32, i32
  }
  func.func @transform_1(%arg0: i32, %arg1: i32, %arg2: i32) -> (i32, i32) {
    %c0_i32 = arith.constant 0 : i32
    return %arg1, %arg2 : i32, i32
  }
  func.func @transform_2(%arg0: i32, %arg1: i32, %arg2: i32) -> (i32, i32) {
    %c0_i32 = arith.constant 0 : i32
    return %arg0, %arg1 : i32, i32
  }
}

</mosaic_0001>

<bundles_post_ra>
// kernel: tpu_custom_call.1
= control target key start
LH: loop header
LB: loop body
LE: loop exit
PB: predicated region body
PF: predicated region fallthrough
CT: control target
= control target key end

     0   :  { %7 = vsyncpa [#allocation4], 0  ;;  %s448_s0 = inlined_call_operand.hbm [shape: f32[8,128], index: 0, kind: input, shape index: {}]   ;;  %s449_s1 = inlined_call_operand.hbm [shape: f32[128,128], index: 1, kind: input, shape index: {}]   ;;  %s450_s2 = inlined_call_operand.hbm [shape: f32[8,128], index: 2, kind: output, shape index: {}]  }
   0x1   :  { %8 = vsyncpa [#allocation7], 0 }
   0x2   :  { %9 = vsyncpa [#allocation5], 0  ;;  %s374_s9 = smov [#allocation3]   ;;  %s375_s11 = smov [#allocation6]  }
   0x3   :  { %s16_s10 = sshll.u32 %s374_s9, 4  ;;  %s25_s12 = sshll.u32 %s375_s11, 4  ;;  %s17_s10 = int_to_ptr.vmem [resolvable:$true] %s16_s10  ;;  %s397_s12 = int_to_ptr.vmem [resolvable:$true] %s25_s12 }
   0x4   :  { %s302_s15 = scalar_lea.hbm %s448_s0, 128 }
   0x5   :  { %p303_p0 = scmp.ne.s32.totalorder %s448_s0, %s302_s15  ;;  %p306_p1 = scmp.lt.u32.totalorder %s302_s15, %s448_s0 }
   0x7   :  { %p308_p2 = pnand %p306_p1, %p303_p0 }
   0x9   :  { %311 = shalt.err (!%p308_p2)
}
   0xa   :  { %s312_s20 = scalar_lea.vmem %s17_s10, 128  ;;  %p317_p4 = scmp.lt.s32.totalorder %s17_s10, %s17_s10 }
   0xb   :  { %p313_p3 = scmp.ne.s32.totalorder %s17_s10, %s312_s20  ;;  %p318_p5 = scmp.lt.s32.totalorder %s312_s20, %s312_s20 }
   0xd   :  { %p319_p6 = por %p318_p5, %p317_p4 }
   0xf   :  { %p320_p7 = pnand %p319_p6, %p313_p3 }
  0x11   :  { %323 = shalt.err (!%p320_p7)
}
  0x12   :  { %19 = dma.hbm_to_vmem [thread:$0]  %s448_s0, 128, %s17_s10, [#allocation4]  }
  0x13   :  { %s324_s25 = scalar_lea.hbm %s449_s1, 2048 }
  0x14   :  { %p325_p8 = scmp.ne.s32.totalorder %s449_s1, %s324_s25  ;;  %p328_p9 = scmp.lt.u32.totalorder %s324_s25, %s449_s1 }
  0x16   :  { %p330_p10 = pnand %p328_p9, %p325_p8 }
  0x18   :  { %333 = shalt.err (!%p330_p10)
}
  0x19   :  { %s334_s30 = scalar_lea.vmem %s397_s12, 2048  ;;  %p339_p12 = scmp.lt.s32.totalorder %s397_s12, %s397_s12 }
  0x1a   :  { %p335_p11 = scmp.ne.s32.totalorder %s397_s12, %s334_s30  ;;  %p340_p13 = scmp.lt.s32.totalorder %s334_s30, %s334_s30 }
  0x1c   :  { %p341_p0 = por %p340_p13, %p339_p12 }
  0x1e   :  { %p342_p1 = pnand %p341_p0, %p335_p11 }
  0x20   :  { %345 = shalt.err (!%p342_p1)
}
  0x21   :  { %s376_s0 = smov 128   ;;  %s377_s3 = smov 8  }
  0x22   :  { %31 = dma.hbm_to_vmem [thread:$0]  %s449_s1, 2048, %s397_s12, [#allocation7], %s376_s0, %s376_s0, %s377_s3  }
  0x23   :  { %368 = dma.done.wait [#allocation4], 128  }
  0x24   :  { %369 = vsyncadd [#allocation4], 4294967168 }
  0x25   :  { %370 = dma.done.wait [#allocation7], 2048  }
  0x26   :  { %371 = vsyncadd [#allocation7], 4294965248  ;;  %v378_v0 = vmov 0.0|0.0   ;;  %vm379_vm0 = vmmov 0   ;;  %v380_v1 = vmov 0.0   ;;  %v43_v2 = vld [vmem:[#allocation6] sm:$0xff] }
  0x27   :  { %238 = vmatprep.subr.bf16.mxu0 %v378_v0  ;;  %235 = vmatprep.mubr.msk.f32.mxu0 %vm379_vm0, %v380_v1  ;;  %v44_v3 = vld [vmem:[#allocation6 + $0x8] sm:$0xff]  ;;  %v45_v4 = vld [vmem:[#allocation6 + $0x10] sm:$0xff]  ;;  %v59_v5 = vmul.f32 1.442695, %v43_v2  ;;  %v46_v7 = vld [vmem:[#allocation6 + $0x18] sm:$0xff]  ;;  %s381_s1 = smov [#allocation8]  }
  0x28   :  { %v61_v6 = vmul.f32 1.442695, %v44_v3  ;;  %v63_v8 = vmul.f32 1.442695, %v45_v4  ;;  %v65_v9 = vmul.f32 1.442695, %v46_v7 }
  0x29   :  { %270 = vpow2.f32 %v59_v5  ;;  %v47_v10 = vld [vmem:[#allocation6 + $0x20] sm:$0xff]  ;;  %v48_v11 = vld [vmem:[#allocation6 + $0x28] sm:$0xff]  ;;  %v49_v17 = vld [vmem:[#allocation6 + $0x30] sm:$0xff]  ;;  %s176_s6 = sshll.u32 %s381_s1, 4  ;;  %s177_s6 = int_to_ptr.vmem [resolvable:$true] %s176_s6 }
  0x2a   :  { %272 = vpow2.f32 %v61_v6  ;;  %v67_v12 = vmul.f32 1.442695, %v47_v10  ;;  %v69_v13 = vmul.f32 1.442695, %v48_v11  ;;  %v50_v19 = vld [vmem:[#allocation6 + $0x38] sm:$0xff]  ;;  %v51_v24 = vld [vmem:[#allocation6 + $0x40] sm:$0xff]  ;;  %p351_p3 = scmp.lt.s32.totalorder %s177_s6, %s177_s6 }
  0x2b   :  { %274 = vpow2.f32 %v63_v8  ;;  %v71_v21 = vmul.f32 1.442695, %v49_v17  ;;  %v73_v22 = vmul.f32 1.442695, %v50_v19  ;;  %v52_v26 = vld [vmem:[#allocation6 + $0x48] sm:$0xff]  ;;  %v53_v31 = vld [vmem:[#allocation6 + $0x50] sm:$0xff] }
  0x2c   :  { %276 = vpow2.f32 %v65_v9  ;;  %v75_v28 = vmul.f32 1.442695, %v51_v24  ;;  %v77_v29 = vmul.f32 1.442695, %v52_v26  ;;  %v54_v33 = vld [vmem:[#allocation6 + $0x58] sm:$0xff]  ;;  %v55_v38 = vld [vmem:[#allocation6 + $0x60] sm:$0xff] }
  0x2d   :  { %278 = vpow2.f32 %v67_v12  ;;  %v79_v35 = vmul.f32 1.442695, %v53_v31  ;;  %v81_v36 = vmul.f32 1.442695, %v54_v33  ;;  %v56_v40 = vld [vmem:[#allocation6 + $0x68] sm:$0xff]  ;;  %v57_v45 = vld [vmem:[#allocation6 + $0x70] sm:$0xff] }
  0x2e   :  { %280 = vpow2.f32 %v69_v13  ;;  %v83_v42 = vmul.f32 1.442695, %v55_v38  ;;  %v85_v43 = vmul.f32 1.442695, %v56_v40  ;;  %v58_v47 = vld [vmem:[#allocation6 + $0x78] sm:$0xff]  ;;  %s346_s7 = scalar_lea.vmem %s177_s6, 128 }
  0x2f   :  { %282 = vpow2.f32 %v71_v21  ;;  %v87_v49 = vmul.f32 1.442695, %v57_v45  ;;  %v89_v50 = vmul.f32 1.442695, %v58_v47  ;;  %v91_v58 = vld [vmem:[#allocation3] sm:$0xff]  ;;  %p347_p2 = scmp.ne.s32.totalorder %s177_s6, %s346_s7  ;;  %p352_p4 = scmp.lt.s32.totalorder %s346_s7, %s346_s7 }
  0x30   :  { %284 = vpow2.f32 %v73_v22 }
  0x31   :  { %286 = vpow2.f32 %v75_v28  ;;  %p353_p5 = por %p352_p4, %p351_p3 }
  0x32   :  { %288 = vpow2.f32 %v77_v29 }
  0x33   :  { %v271_v14 = vpop.eup %270  ;;  %290 = vpow2.f32 %v79_v35  ;;  %p354_p6 = pnand %p353_p5, %p347_p2 }
  0x34   :  { %v273_v15 = vpop.eup %272  ;;  %292 = vpow2.f32 %v81_v36 }
  0x35   :  { %v239_v16 = vpack.c.bf16 %v273_v15, %v271_v14  ;;  %v275_v18 = vpop.eup %274  ;;  %294 = vpow2.f32 %v83_v42 }
  0x36   :  { %v277_v20 = vpop.eup %276  ;;  %296 = vpow2.f32 %v85_v43 }
  0x37   :  { %240 = vmatpush3.bf16.xpose.msra.mxu0 %v239_v16  ;;  %v242_v23 = vpack.c.bf16 %v277_v20, %v275_v18  ;;  %v279_v25 = vpop.eup %278  ;;  %298 = vpow2.f32 %v87_v49 }
  0x38   :  { %241 = vmatprep.subr.bf16.mxu0 %v378_v0  ;;  %v281_v27 = vpop.eup %280  ;;  %300 = vpow2.f32 %v89_v50 }
  0x39   :  { %v245_v30 = vpack.c.bf16 %v281_v27, %v279_v25  ;;  %v283_v32 = vpop.eup %282 }
  0x3a   :  { %v285_v34 = vpop.eup %284 }
  0x3b   :  { %v248_v37 = vpack.c.bf16 %v285_v34, %v283_v32  ;;  %v287_v39 = vpop.eup %286 }
  0x3c   :  { %v289_v41 = vpop.eup %288 }
  0x3d   :  { %v251_v44 = vpack.c.bf16 %v289_v41, %v287_v39  ;;  %v291_v46 = vpop.eup %290 }
  0x3e   :  { %v293_v48 = vpop.eup %292 }
  0x3f   :  { %243 = vmatpush3.bf16.xpose.msra.mxu0 %v242_v23  ;;  %v254_v51 = vpack.c.bf16 %v293_v48, %v291_v46  ;;  %v295_v52 = vpop.eup %294 }
  0x40   :  { %244 = vmatprep.subr.bf16.mxu0 %v378_v0  ;;  %v297_v53 = vpop.eup %296 }
  0x41   :  { %v257_v54 = vpack.c.bf16 %v297_v53, %v295_v52  ;;  %v299_v55 = vpop.eup %298 }
  0x42   :  { %v301_v56 = vpop.eup %300 }
  0x43   :  { %v260_v57 = vpack.c.bf16 %v301_v56, %v299_v55 }
  0x47   :  { %246 = vmatpush3.bf16.xpose.msra.mxu0 %v245_v30 }
  0x48   :  { %247 = vmatprep.subr.bf16.mxu0 %v378_v0 }
  0x4f   :  { %249 = vmatpush3.bf16.xpose.msra.mxu0 %v248_v37 }
  0x50   :  { %250 = vmatprep.subr.bf16.mxu0 %v378_v0 }
  0x57   :  { %252 = vmatpush3.bf16.xpose.msra.mxu0 %v251_v44 }
  0x58   :  { %253 = vmatprep.subr.bf16.mxu0 %v378_v0 }
  0x5f   :  { %255 = vmatpush3.bf16.xpose.msra.mxu0 %v254_v51 }
  0x60   :  { %256 = vmatprep.subr.bf16.mxu0 %v378_v0 }
  0x67   :  { %258 = vmatpush3.bf16.xpose.msra.mxu0 %v257_v54 }
  0x68   :  { %259 = vmatprep.subr.bf16.mxu0 %v378_v0 }
  0x6f   :  { %261 = vmatpush3.bf16.xpose.msra.mxu0 %v260_v57 }
  0x76   :  { %236 = vmatmul.mubr.f32.vlgmr.msra.gmra.mrb[0].mxu0 %v91_v58 }
 0x149   :  { %v159_v59 = vpop.f32.mrb[0].mxu0 }
 0x14a   :  { %169 = vst [vmem:[#allocation8] sm:$0xff] %v159_v59  ;;  %v237_v60 = vpop.f32.mrb[1].mxu0 }
 0x14b   :  { %357 = shalt.err (!%p354_p6)
}
 0x14c   :  { %s358_s10 = scalar_lea.hbm %s450_s2, 128 }
 0x14d   :  { %p359_p7 = scmp.ne.s32.totalorder %s450_s2, %s358_s10  ;;  %p362_p8 = scmp.lt.u32.totalorder %s358_s10, %s450_s2 }
 0x14f   :  { %p364_p9 = pnand %p362_p8, %p359_p7 }
 0x151   :  { %367 = shalt.err (!%p364_p9)
}
 0x152   :  { %179 = dma.vmem_to_hbm [thread:$0]  %s177_s6, 128, %s450_s2, [#allocation5]  }
 0x153   :  { %372 = dma.done.wait [#allocation5], 128  }
 0x154   :  { %373 = vsyncadd [#allocation5], 4294967168 }
 0x155   :  { %183 = vsyncpa [#allocation4], 1 }
 0x156   :  { %184 = vsyncpa [#allocation7], 1 }
 0x157   :  { %185 = vsyncpa [#allocation5], 1 }

</bundles_post_ra>
